<compile_context>
chip_gen: v6e
topology: v6e:2x2x1
jax: 0.10.0
libtpu: 0.0.40
codegen_flags: <defaults>
</compile_context>

<pallas_src>
import functools

import jax
import jax.numpy as jnp
import numpy as np
from jax import lax
from jax.experimental import pallas as pl
from jax.experimental.pallas import tpu as pltpu

KERNEL_SIZE = 1

# ---------------------------------------------------------------------------
# VMEM budgeting: derive limits from the chip.  A BlockSpec pipeline keeps two
# buffers per stream, so the single-copy per-step budget is ~1/3 of the limit
# (2 buffers + scheduler/internal-scratch headroom).
# ---------------------------------------------------------------------------
try:
    _VMEM_CAP = int(pltpu.get_tpu_info().vmem_capacity_bytes)
except Exception:  # conservative fallback == v7x per-core VMEM
    _VMEM_CAP = 64 * 1024 * 1024
_VMEM_LIMIT = min(int(_VMEM_CAP * 0.75), 100 * 1024 * 1024)
_PER_STEP_BUDGET = _VMEM_LIMIT // 3


def _round_up(x, m):
    return (x + m - 1) // m * m


def _pick_tile(total, per_lane_bytes, max_tile):
    """Lane tile: multiple of 128, <= max_tile, sized to the per-step budget."""
    by_budget = (_PER_STEP_BUDGET // max(per_lane_bytes, 1)) // 128 * 128
    t = min(max_tile, max(128, by_budget))
    return min(t, _round_up(total, 128))


# --------------------------------------------------------------------------
# Kernel A: complex spectral multiply  out[b,o,m] = sum_i x[b,i,m] * w[i,o,m]
# (torch.einsum('bixy,ioxy->boxy') hot path, split into real/imag parts).
# Grid = (mode_tiles, cout_tiles); the x blocks keep the same index across the
# inner C_out axis (no re-DMA) and each weight tile is reused by all batches.
# --------------------------------------------------------------------------
def spectral_mul_kernel(xr_ref, xi_ref, wr_ref, wi_ref, or_ref, oi_ref):
    # xr/xi: (B, C_in, TM)   wr/wi: (C_in, TCO, TM)   or/oi: (B, TCO, TM)
    batch, c_in, tm = xr_ref.shape
    tco = wr_ref.shape[1]

    # Accumulators are (TCO, TM) <= (8, 512) f32 -> register-resident, no
    # spilling.  The channel loop is unrolled in chunks so the LLO scheduler
    # can overlap the sublane loads with the VALU MACs.
    unroll = True if c_in <= 8 else (4 if tco <= 8 else 2)

    def chan_body(b, i, carry):
        acc_r, acc_i = carry
        xr_i = xr_ref[b, pl.ds(i, 1), :]          # (1, TM) row, broadcasts
        xi_i = xi_ref[b, pl.ds(i, 1), :]
        wr_i = wr_ref[i]                          # (TCO, TM)
        wi_i = wi_ref[i]
        acc_r = acc_r + xr_i * wr_i - xi_i * wi_i
        acc_i = acc_i + xr_i * wi_i + xi_i * wr_i
        return acc_r, acc_i

    def batch_body(b, _):
        init = (jnp.zeros((tco, tm), jnp.float32),
                jnp.zeros((tco, tm), jnp.float32))
        acc_r, acc_i = lax.fori_loop(0, c_in, functools.partial(chan_body, b),
                                     init, unroll=unroll)
        or_ref[b] = acc_r
        oi_ref[b] = acc_i
        return 0

    lax.fori_loop(0, batch, batch_body, 0, unroll=(batch <= 4))


# --------------------------------------------------------------------------
# Kernel B: 1x1 Conv1d (channel contraction) + bias + spectral branch add + ReLU
# Grid = (batch, spatial_tiles); weight/bias blocks ignore both grid indices.
# --------------------------------------------------------------------------
def pointwise_kernel(x_ref, x1_ref, w_ref, b_ref, o_ref):
    # x: (1, C_in, TS)  x1: (1, C_out, TS)  w: (C_out, C_in)  b: (C_out, 1)
    x = x_ref[0]                                  # (C_in, TS)
    w = w_ref[...]                                # (C_out, C_in)
    c_out, c_in = w.shape
    if c_in >= 8:
        # MXU contraction keeps all 4 VALU slots free for the epilogue; the
        # kernel stays a pure HBM stream.
        y = jnp.dot(w, x, preferred_element_type=jnp.float32)
    else:
        # Tiny contraction (demo path): exact f32 VPU broadcast-MAC.
        y = jnp.zeros((c_out, x.shape[1]), jnp.float32)
        for i in range(c_in):                     # static, < 8 iterations
            y = y + w[:, i:i + 1] * x[i:i + 1, :]
    y = y + b_ref[...]                            # bias broadcast (C_out, 1)
    y = y + x1_ref[0]                             # spectral-branch residual
    o_ref[0] = jnp.maximum(y, 0.0)                # ReLU


# --------------------------------------------------------------------------
# Wrapper: FFT glue in plain JAX, compute in Pallas
# --------------------------------------------------------------------------
@functools.partial(jax.jit, static_argnums=(7,))
def fno_block_forward(x, w1_r, w1_i, w2_r, w2_i, conv_w, conv_b, modes):
    B, C_in, H, W = x.shape
    C_out = w1_r.shape[1]
    Wf = W // 2 + 1

    # ---------------- spectral branch ----------------
    # TODO(synk): rfft2/irfft2 have no Pallas equivalent; done in plain JAX.
    x_ft = jnp.fft.rfft2(x)                                   # (B,C_in,H,Wf) c64

    top = x_ft[:, :, :modes, :modes]
    bot = x_ft[:, :, H - modes:, :modes]
    x_modes = jnp.concatenate([top, bot], axis=2)             # (B,C_in,2m,m)
    w_r = jnp.concatenate([w1_r, w2_r], axis=2)               # (C_in,C_out,2m,m)
    w_i = jnp.concatenate([w1_i, w2_i], axis=2)

    M = 2 * modes * modes
    # C_out tile: <= 8 sublanes keeps the per-step accumulator register-resident
    # (must be a multiple of 8 or the full extent for the (8,128) layout rule).
    tco = 8 if C_out % 8 == 0 else C_out
    # per-lane f32 bytes per step: x(2*B*C_in) + w(2*C_in*tco) + out(2*B*tco)
    per_lane = 4 * (2 * B * C_in + 2 * C_in * tco + 2 * B * tco)
    tm = _pick_tile(M, per_lane, max_tile=512)   # 512 cap bounds vreg pressure
    M_pad = _round_up(M, tm)
    pad = M_pad - M

    def flat_pad(a, lead):
        a = a.reshape(*lead, M).astype(jnp.float32)
        return jnp.pad(a, [(0, 0)] * len(lead) + [(0, pad)]) if pad else a

    xr = flat_pad(jnp.real(x_modes), (B, C_in))
    xi = flat_pad(jnp.imag(x_modes), (B, C_in))
    wr = flat_pad(w_r, (C_in, C_out))
    wi = flat_pad(w_i, (C_in, C_out))

    out_r, out_i = pl.pallas_call(
        spectral_mul_kernel,
        grid=(M_pad // tm, C_out // tco),        # mode tiles outer, C_out inner
        in_specs=[
            pl.BlockSpec((B, C_in, tm), lambda m, co: (0, 0, m)),
            pl.BlockSpec((B, C_in, tm), lambda m, co: (0, 0, m)),
            pl.BlockSpec((C_in, tco, tm), lambda m, co: (0, co, m)),
            pl.BlockSpec((C_in, tco, tm), lambda m, co: (0, co, m)),
        ],
        out_specs=[
            pl.BlockSpec((B, tco, tm), lambda m, co: (0, co, m)),
            pl.BlockSpec((B, tco, tm), lambda m, co: (0, co, m)),
        ],
        out_shape=(
            jax.ShapeDtypeStruct((B, C_out, M_pad), jnp.float32),
            jax.ShapeDtypeStruct((B, C_out, M_pad), jnp.float32),
        ),
        compiler_params=pltpu.CompilerParams(
            # Shard only the mode-tile axis across TensorCores (v7x): weight
            # streams stay disjoint per core; C_out tiles stay sequential.
            dimension_semantics=("parallel", "arbitrary"),
            vmem_limit_bytes=_VMEM_LIMIT),
    )(xr, xi, wr, wi)

    out_modes = (out_r[:, :, :M] + 1j * out_i[:, :, :M]).astype(jnp.complex64)
    out_modes = out_modes.reshape(B, C_out, 2 * modes, modes)
    out_ft = jnp.zeros((B, C_out, H, Wf), jnp.complex64)
    out_ft = out_ft.at[:, :, :modes, :modes].set(out_modes[:, :, :modes])
    out_ft = out_ft.at[:, :, H - modes:, :modes].set(out_modes[:, :, modes:])
    x1 = jnp.fft.irfft2(out_ft, s=(H, W)).astype(jnp.float32)  # (B,C_out,H,W)

    # ---------------- pointwise branch + residual add + ReLU ----------------
    S = H * W
    per_lane = 4 * (C_in + 2 * C_out)            # x + x1 + out per lane, f32
    ts = _pick_tile(S, per_lane, max_tile=2048)
    S_pad = _round_up(S, ts)
    sp = S_pad - S
    x_flat = x.reshape(B, C_in, S).astype(jnp.float32)
    x1_flat = x1.reshape(B, C_out, S)
    if sp:
        x_flat = jnp.pad(x_flat, ((0, 0), (0, 0), (0, sp)))
        x1_flat = jnp.pad(x1_flat, ((0, 0), (0, 0), (0, sp)))
    bias2d = conv_b.reshape(C_out, 1).astype(jnp.float32)

    out = pl.pallas_call(
        pointwise_kernel,
        grid=(B, S_pad // ts),
        in_specs=[
            pl.BlockSpec((1, C_in, ts), lambda b, s: (b, 0, s)),
            pl.BlockSpec((1, C_out, ts), lambda b, s: (b, 0, s)),
            pl.BlockSpec((C_out, C_in), lambda b, s: (0, 0)),
            pl.BlockSpec((C_out, 1), lambda b, s: (0, 0)),
        ],
        out_specs=pl.BlockSpec((1, C_out, ts), lambda b, s: (b, 0, s)),
        out_shape=jax.ShapeDtypeStruct((B, C_out, S_pad), jnp.float32),
        # NOTE: aliasing is safe only because x1's and out's BlockSpecs are
        # identical and x1 is fully read before o_ref is written.
        input_output_aliases={1: 0},
        compiler_params=pltpu.CompilerParams(
            dimension_semantics=("parallel", "parallel"),
            vmem_limit_bytes=_VMEM_LIMIT),
    )(x_flat, x1_flat, conv_w.astype(jnp.float32), bias2d)

    return out[:, :, :S].reshape(B, C_out, H, W)


# --------------------------------------------------------------------------
# Pure-JAX reference (mirrors the PyTorch forward) for a correctness check
# --------------------------------------------------------------------------
def fno_block_ref(x, w1, w2, conv_w, conv_b, modes):
    B, C_in, H, W = x.shape
    C_out = w1.shape[1]
    x_ft = jnp.fft.rfft2(x)
    out_ft = jnp.zeros((B, C_out, H, W // 2 + 1), jnp.complex64)
    out_ft = out_ft.at[:, :, :modes, :modes].set(
        jnp.einsum('bixy,ioxy->boxy', x_ft[:, :, :modes, :modes], w1))
    out_ft = out_ft.at[:, :, -modes:, :modes].set(
        jnp.einsum('bixy,ioxy->boxy', x_ft[:, :, -modes:, :modes], w2))
    x1 = jnp.fft.irfft2(out_ft, s=(H, W))
    x2 = jnp.einsum('oi,bis->bos', conv_w, x.reshape(B, C_in, -1))
    x2 = x2 + conv_b[None, :, None]
    x2 = x2.reshape(B, C_out, H, W)
    return jnp.maximum(x1 + x2, 0.0)


if __name__ == "__main__":
    B, C_in, C_out, H, W, modes = 2, 4, 4, 16, 16, 4

    key = jax.random.PRNGKey(0)
    k_x, k_w1r, k_w1i, k_w2r, k_w2i, k_cw, k_cb = jax.random.split(key, 7)

    x = jax.random.normal(k_x, (B, C_in, H, W), dtype=jnp.float32)

    # SpectralConv2d weights: scale * rand(...) complex, scale = 1/(Cin*Cout)
    scale = 1.0 / (C_in * C_out)
    w1_r = scale * jax.random.uniform(k_w1r, (C_in, C_out, modes, modes), jnp.float32)
    w1_i = scale * jax.random.uniform(k_w1i, (C_in, C_out, modes, modes), jnp.float32)
    w2_r = scale * jax.random.uniform(k_w2r, (C_in, C_out, modes, modes), jnp.float32)
    w2_i = scale * jax.random.uniform(k_w2i, (C_in, C_out, modes, modes), jnp.float32)

    # Conv1d(in, out, kernel_size=1): weight (C_out, C_in), bias (C_out,)
    bound = 1.0 / np.sqrt(C_in * KERNEL_SIZE)
    conv_w = jax.random.uniform(k_cw, (C_out, C_in), jnp.float32, -bound, bound)
    conv_b = jax.random.uniform(k_cb, (C_out,), jnp.float32, -bound, bound)

    out = fno_block_forward(x, w1_r, w1_i, w2_r, w2_i, conv_w, conv_b, modes)
    out = jax.block_until_ready(out)

    # correctness check against the pure-JAX reference of the torch forward
    w1 = (w1_r + 1j * w1_i).astype(jnp.complex64)
    w2 = (w2_r + 1j * w2_i).astype(jnp.complex64)
    ref = jax.block_until_ready(fno_block_ref(x, w1, w2, conv_w, conv_b, modes))
    np.testing.assert_allclose(np.asarray(out), np.asarray(ref),
                               rtol=1e-4, atol=1e-4)

    print("KERNEL_OK")
</pallas_src>

<mosaic_0001>
module attributes {stable_mosaic.version = 11 : i64} {
  func.func @spectral_mul_kernel(%arg0: i32, %arg1: i32, %arg2: memref<2x4x128xf32, #tpu.memory_space<vmem>>, %arg3: memref<2x4x128xf32, #tpu.memory_space<vmem>>, %arg4: memref<4x4x128xf32, #tpu.memory_space<vmem>>, %arg5: memref<4x4x128xf32, #tpu.memory_space<vmem>>, %arg6: memref<2x4x128xf32, #tpu.memory_space<vmem>>, %arg7: memref<2x4x128xf32, #tpu.memory_space<vmem>>) attributes {dimension_semantics = [#tpu.dimension_semantics<parallel>, #tpu.dimension_semantics<arbitrary>], iteration_bounds = array<i64: 1, 1>, scalar_prefetch = 0 : i64, scratch_operands = 0 : i64, tpu.core_type = #tpu.core_type<tc>, window_params = [{transform_indices = @transform_0, window_bounds = array<i64: 2, 4, 128>}, {transform_indices = @transform_1, window_bounds = array<i64: 2, 4, 128>}, {transform_indices = @transform_2, window_bounds = array<i64: 4, 4, 128>}, {transform_indices = @transform_3, window_bounds = array<i64: 4, 4, 128>}, {transform_indices = @transform_4, window_bounds = array<i64: 2, 4, 128>}, {transform_indices = @transform_5, window_bounds = array<i64: 2, 4, 128>}]} {
    %c0_i32 = arith.constant 0 : i32
    %cst = arith.constant 0.000000e+00 : f32
    %0 = vector.broadcast %cst : f32 to vector<4x128xf32>
    %cst_0 = arith.constant 0.000000e+00 : f32
    %1 = vector.broadcast %cst_0 : f32 to vector<4x128xf32>
    %c0_i32_1 = arith.constant 0 : i32
    %2 = arith.index_cast %c0_i32 : i32 to index
    %3 = arith.index_cast %c0_i32_1 : i32 to index
    %c0 = arith.constant 0 : index
    %4 = vector.load %arg2[%2, %3, %c0] : memref<2x4x128xf32, #tpu.memory_space<vmem>>, vector<1x1x128xf32>
    %5 = vector.shape_cast %4 : vector<1x1x128xf32> to vector<1x128xf32>
    %6 = arith.index_cast %c0_i32 : i32 to index
    %7 = arith.index_cast %c0_i32_1 : i32 to index
    %c0_2 = arith.constant 0 : index
    %8 = vector.load %arg3[%6, %7, %c0_2] : memref<2x4x128xf32, #tpu.memory_space<vmem>>, vector<1x1x128xf32>
    %9 = vector.shape_cast %8 : vector<1x1x128xf32> to vector<1x128xf32>
    %10 = arith.index_cast %c0_i32_1 : i32 to index
    %c0_3 = arith.constant 0 : index
    %c0_4 = arith.constant 0 : index
    %11 = vector.load %arg4[%10, %c0_3, %c0_4] : memref<4x4x128xf32, #tpu.memory_space<vmem>>, vector<1x4x128xf32>
    %12 = vector.shape_cast %11 : vector<1x4x128xf32> to vector<4x128xf32>
    %13 = arith.index_cast %c0_i32_1 : i32 to index
    %c0_5 = arith.constant 0 : index
    %c0_6 = arith.constant 0 : index
    %14 = vector.load %arg5[%13, %c0_5, %c0_6] : memref<4x4x128xf32, #tpu.memory_space<vmem>>, vector<1x4x128xf32>
    %15 = vector.shape_cast %14 : vector<1x4x128xf32> to vector<4x128xf32>
    %16 = vector.broadcast %5 : vector<1x128xf32> to vector<4x128xf32>
    %17 = arith.mulf %16, %12 : vector<4x128xf32>
    %18 = arith.addf %0, %17 : vector<4x128xf32>
    %19 = vector.broadcast %9 : vector<1x128xf32> to vector<4x128xf32>
    %20 = arith.mulf %19, %15 : vector<4x128xf32>
    %21 = arith.subf %18, %20 : vector<4x128xf32>
    %22 = vector.broadcast %5 : vector<1x128xf32> to vector<4x128xf32>
    %23 = arith.mulf %22, %15 : vector<4x128xf32>
    %24 = arith.addf %1, %23 : vector<4x128xf32>
    %25 = vector.broadcast %9 : vector<1x128xf32> to vector<4x128xf32>
    %26 = arith.mulf %25, %12 : vector<4x128xf32>
    %27 = arith.addf %24, %26 : vector<4x128xf32>
    %c1_i32 = arith.constant 1 : i32
    %28 = arith.index_cast %c0_i32 : i32 to index
    %29 = arith.index_cast %c1_i32 : i32 to index
    %c0_7 = arith.constant 0 : index
    %30 = vector.load %arg2[%28, %29, %c0_7] : memref<2x4x128xf32, #tpu.memory_space<vmem>>, vector<1x1x128xf32>
    %31 = vector.shape_cast %30 : vector<1x1x128xf32> to vector<1x128xf32>
    %32 = arith.index_cast %c0_i32 : i32 to index
    %33 = arith.index_cast %c1_i32 : i32 to index
    %c0_8 = arith.constant 0 : index
    %34 = vector.load %arg3[%32, %33, %c0_8] : memref<2x4x128xf32, #tpu.memory_space<vmem>>, vector<1x1x128xf32>
    %35 = vector.shape_cast %34 : vector<1x1x128xf32> to vector<1x128xf32>
    %36 = arith.index_cast %c1_i32 : i32 to index
    %c0_9 = arith.constant 0 : index
    %c0_10 = arith.constant 0 : index
    %37 = vector.load %arg4[%36, %c0_9, %c0_10] : memref<4x4x128xf32, #tpu.memory_space<vmem>>, vector<1x4x128xf32>
    %38 = vector.shape_cast %37 : vector<1x4x128xf32> to vector<4x128xf32>
    %39 = arith.index_cast %c1_i32 : i32 to index
    %c0_11 = arith.constant 0 : index
    %c0_12 = arith.constant 0 : index
    %40 = vector.load %arg5[%39, %c0_11, %c0_12] : memref<4x4x128xf32, #tpu.memory_space<vmem>>, vector<1x4x128xf32>
    %41 = vector.shape_cast %40 : vector<1x4x128xf32> to vector<4x128xf32>
    %42 = vector.broadcast %31 : vector<1x128xf32> to vector<4x128xf32>
    %43 = arith.mulf %42, %38 : vector<4x128xf32>
    %44 = arith.addf %21, %43 : vector<4x128xf32>
    %45 = vector.broadcast %35 : vector<1x128xf32> to vector<4x128xf32>
    %46 = arith.mulf %45, %41 : vector<4x128xf32>
    %47 = arith.subf %44, %46 : vector<4x128xf32>
    %48 = vector.broadcast %31 : vector<1x128xf32> to vector<4x128xf32>
    %49 = arith.mulf %48, %41 : vector<4x128xf32>
    %50 = arith.addf %27, %49 : vector<4x128xf32>
    %51 = vector.broadcast %35 : vector<1x128xf32> to vector<4x128xf32>
    %52 = arith.mulf %51, %38 : vector<4x128xf32>
    %53 = arith.addf %50, %52 : vector<4x128xf32>
    %c2_i32 = arith.constant 2 : i32
    %54 = arith.index_cast %c0_i32 : i32 to index
    %55 = arith.index_cast %c2_i32 : i32 to index
    %c0_13 = arith.constant 0 : index
    %56 = vector.load %arg2[%54, %55, %c0_13] : memref<2x4x128xf32, #tpu.memory_space<vmem>>, vector<1x1x128xf32>
    %57 = vector.shape_cast %56 : vector<1x1x128xf32> to vector<1x128xf32>
    %58 = arith.index_cast %c0_i32 : i32 to index
    %59 = arith.index_cast %c2_i32 : i32 to index
    %c0_14 = arith.constant 0 : index
    %60 = vector.load %arg3[%58, %59, %c0_14] : memref<2x4x128xf32, #tpu.memory_space<vmem>>, vector<1x1x128xf32>
    %61 = vector.shape_cast %60 : vector<1x1x128xf32> to vector<1x128xf32>
    %62 = arith.index_cast %c2_i32 : i32 to index
    %c0_15 = arith.constant 0 : index
    %c0_16 = arith.constant 0 : index
    %63 = vector.load %arg4[%62, %c0_15, %c0_16] : memref<4x4x128xf32, #tpu.memory_space<vmem>>, vector<1x4x128xf32>
    %64 = vector.shape_cast %63 : vector<1x4x128xf32> to vector<4x128xf32>
    %65 = arith.index_cast %c2_i32 : i32 to index
    %c0_17 = arith.constant 0 : index
    %c0_18 = arith.constant 0 : index
    %66 = vector.load %arg5[%65, %c0_17, %c0_18] : memref<4x4x128xf32, #tpu.memory_space<vmem>>, vector<1x4x128xf32>
    %67 = vector.shape_cast %66 : vector<1x4x128xf32> to vector<4x128xf32>
    %68 = vector.broadcast %57 : vector<1x128xf32> to vector<4x128xf32>
    %69 = arith.mulf %68, %64 : vector<4x128xf32>
    %70 = arith.addf %47, %69 : vector<4x128xf32>
    %71 = vector.broadcast %61 : vector<1x128xf32> to vector<4x128xf32>
    %72 = arith.mulf %71, %67 : vector<4x128xf32>
    %73 = arith.subf %70, %72 : vector<4x128xf32>
    %74 = vector.broadcast %57 : vector<1x128xf32> to vector<4x128xf32>
    %75 = arith.mulf %74, %67 : vector<4x128xf32>
    %76 = arith.addf %53, %75 : vector<4x128xf32>
    %77 = vector.broadcast %61 : vector<1x128xf32> to vector<4x128xf32>
    %78 = arith.mulf %77, %64 : vector<4x128xf32>
    %79 = arith.addf %76, %78 : vector<4x128xf32>
    %c3_i32 = arith.constant 3 : i32
    %80 = arith.index_cast %c0_i32 : i32 to index
    %81 = arith.index_cast %c3_i32 : i32 to index
    %c0_19 = arith.constant 0 : index
    %82 = vector.load %arg2[%80, %81, %c0_19] : memref<2x4x128xf32, #tpu.memory_space<vmem>>, vector<1x1x128xf32>
    %83 = vector.shape_cast %82 : vector<1x1x128xf32> to vector<1x128xf32>
    %84 = arith.index_cast %c0_i32 : i32 to index
    %85 = arith.index_cast %c3_i32 : i32 to index
    %c0_20 = arith.constant 0 : index
    %86 = vector.load %arg3[%84, %85, %c0_20] : memref<2x4x128xf32, #tpu.memory_space<vmem>>, vector<1x1x128xf32>
    %87 = vector.shape_cast %86 : vector<1x1x128xf32> to vector<1x128xf32>
    %88 = arith.index_cast %c3_i32 : i32 to index
    %c0_21 = arith.constant 0 : index
    %c0_22 = arith.constant 0 : index
    %89 = vector.load %arg4[%88, %c0_21, %c0_22] : memref<4x4x128xf32, #tpu.memory_space<vmem>>, vector<1x4x128xf32>
    %90 = vector.shape_cast %89 : vector<1x4x128xf32> to vector<4x128xf32>
    %91 = arith.index_cast %c3_i32 : i32 to index
    %c0_23 = arith.constant 0 : index
    %c0_24 = arith.constant 0 : index
    %92 = vector.load %arg5[%91, %c0_23, %c0_24] : memref<4x4x128xf32, #tpu.memory_space<vmem>>, vector<1x4x128xf32>
    %93 = vector.shape_cast %92 : vector<1x4x128xf32> to vector<4x128xf32>
    %94 = vector.broadcast %83 : vector<1x128xf32> to vector<4x128xf32>
    %95 = arith.mulf %94, %90 : vector<4x128xf32>
    %96 = arith.addf %73, %95 : vector<4x128xf32>
    %97 = vector.broadcast %87 : vector<1x128xf32> to vector<4x128xf32>
    %98 = arith.mulf %97, %93 : vector<4x128xf32>
    %99 = arith.subf %96, %98 : vector<4x128xf32>
    %100 = vector.broadcast %83 : vector<1x128xf32> to vector<4x128xf32>
    %101 = arith.mulf %100, %93 : vector<4x128xf32>
    %102 = arith.addf %79, %101 : vector<4x128xf32>
    %103 = vector.broadcast %87 : vector<1x128xf32> to vector<4x128xf32>
    %104 = arith.mulf %103, %90 : vector<4x128xf32>
    %105 = arith.addf %102, %104 : vector<4x128xf32>
    %c4_i32 = arith.constant 4 : i32
    %106 = arith.index_cast %c0_i32 : i32 to index
    %c0_25 = arith.constant 0 : index
    %c0_26 = arith.constant 0 : index
    %107 = vector.load %arg6[%106, %c0_25, %c0_26] : memref<2x4x128xf32, #tpu.memory_space<vmem>>, vector<1x4x128xf32>
    %108 = vector.shape_cast %107 : vector<1x4x128xf32> to vector<4x128xf32>
    %109 = vector.shape_cast %99 : vector<4x128xf32> to vector<1x4x128xf32>
    tpu.vector_store %arg6[%106, %c0_25, %c0_26], %109 {strides = array<i32>} : memref<2x4x128xf32, #tpu.memory_space<vmem>>, vector<1x4x128xf32>,
    %110 = arith.index_cast %c0_i32 : i32 to index
    %c0_27 = arith.constant 0 : index
    %c0_28 = arith.constant 0 : index
    %111 = vector.load %arg7[%110, %c0_27, %c0_28] : memref<2x4x128xf32, #tpu.memory_space<vmem>>, vector<1x4x128xf32>
    %112 = vector.shape_cast %111 : vector<1x4x128xf32> to vector<4x128xf32>
    %113 = vector.shape_cast %105 : vector<4x128xf32> to vector<1x4x128xf32>
    tpu.vector_store %arg7[%110, %c0_27, %c0_28], %113 {strides = array<i32>} : memref<2x4x128xf32, #tpu.memory_space<vmem>>, vector<1x4x128xf32>,
    %c1_i32_29 = arith.constant 1 : i32
    %cst_30 = arith.constant 0.000000e+00 : f32
    %114 = vector.broadcast %cst_30 : f32 to vector<4x128xf32>
    %cst_31 = arith.constant 0.000000e+00 : f32
    %115 = vector.broadcast %cst_31 : f32 to vector<4x128xf32>
    %c0_i32_32 = arith.constant 0 : i32
    %116 = arith.index_cast %c1_i32_29 : i32 to index
    %117 = arith.index_cast %c0_i32_32 : i32 to index
    %c0_33 = arith.constant 0 : index
    %118 = vector.load %arg2[%116, %117, %c0_33] : memref<2x4x128xf32, #tpu.memory_space<vmem>>, vector<1x1x128xf32>
    %119 = vector.shape_cast %118 : vector<1x1x128xf32> to vector<1x128xf32>
    %120 = arith.index_cast %c1_i32_29 : i32 to index
    %121 = arith.index_cast %c0_i32_32 : i32 to index
    %c0_34 = arith.constant 0 : index
    %122 = vector.load %arg3[%120, %121, %c0_34] : memref<2x4x128xf32, #tpu.memory_space<vmem>>, vector<1x1x128xf32>
    %123 = vector.shape_cast %122 : vector<1x1x128xf32> to vector<1x128xf32>
    %124 = arith.index_cast %c0_i32_32 : i32 to index
    %c0_35 = arith.constant 0 : index
    %c0_36 = arith.constant 0 : index
    %125 = vector.load %arg4[%124, %c0_35, %c0_36] : memref<4x4x128xf32, #tpu.memory_space<vmem>>, vector<1x4x128xf32>
    %126 = vector.shape_cast %125 : vector<1x4x128xf32> to vector<4x128xf32>
    %127 = arith.index_cast %c0_i32_32 : i32 to index
    %c0_37 = arith.constant 0 : index
    %c0_38 = arith.constant 0 : index
    %128 = vector.load %arg5[%127, %c0_37, %c0_38] : memref<4x4x128xf32, #tpu.memory_space<vmem>>, vector<1x4x128xf32>
    %129 = vector.shape_cast %128 : vector<1x4x128xf32> to vector<4x128xf32>
    %130 = vector.broadcast %119 : vector<1x128xf32> to vector<4x128xf32>
    %131 = arith.mulf %130, %126 : vector<4x128xf32>
    %132 = arith.addf %114, %131 : vector<4x128xf32>
    %133 = vector.broadcast %123 : vector<1x128xf32> to vector<4x128xf32>
    %134 = arith.mulf %133, %129 : vector<4x128xf32>
    %135 = arith.subf %132, %134 : vector<4x128xf32>
    %136 = vector.broadcast %119 : vector<1x128xf32> to vector<4x128xf32>
    %137 = arith.mulf %136, %129 : vector<4x128xf32>
    %138 = arith.addf %115, %137 : vector<4x128xf32>
    %139 = vector.broadcast %123 : vector<1x128xf32> to vector<4x128xf32>
    %140 = arith.mulf %139, %126 : vector<4x128xf32>
    %141 = arith.addf %138, %140 : vector<4x128xf32>
    %c1_i32_39 = arith.constant 1 : i32
    %142 = arith.index_cast %c1_i32_29 : i32 to index
    %143 = arith.index_cast %c1_i32_39 : i32 to index
    %c0_40 = arith.constant 0 : index
    %144 = vector.load %arg2[%142, %143, %c0_40] : memref<2x4x128xf32, #tpu.memory_space<vmem>>, vector<1x1x128xf32>
    %145 = vector.shape_cast %144 : vector<1x1x128xf32> to vector<1x128xf32>
    %146 = arith.index_cast %c1_i32_29 : i32 to index
    %147 = arith.index_cast %c1_i32_39 : i32 to index
    %c0_41 = arith.constant 0 : index
    %148 = vector.load %arg3[%146, %147, %c0_41] : memref<2x4x128xf32, #tpu.memory_space<vmem>>, vector<1x1x128xf32>
    %149 = vector.shape_cast %148 : vector<1x1x128xf32> to vector<1x128xf32>
    %150 = arith.index_cast %c1_i32_39 : i32 to index
    %c0_42 = arith.constant 0 : index
    %c0_43 = arith.constant 0 : index
    %151 = vector.load %arg4[%150, %c0_42, %c0_43] : memref<4x4x128xf32, #tpu.memory_space<vmem>>, vector<1x4x128xf32>
    %152 = vector.shape_cast %151 : vector<1x4x128xf32> to vector<4x128xf32>
    %153 = arith.index_cast %c1_i32_39 : i32 to index
    %c0_44 = arith.constant 0 : index
    %c0_45 = arith.constant 0 : index
    %154 = vector.load %arg5[%153, %c0_44, %c0_45] : memref<4x4x128xf32, #tpu.memory_space<vmem>>, vector<1x4x128xf32>
    %155 = vector.shape_cast %154 : vector<1x4x128xf32> to vector<4x128xf32>
    %156 = vector.broadcast %145 : vector<1x128xf32> to vector<4x128xf32>
    %157 = arith.mulf %156, %152 : vector<4x128xf32>
    %158 = arith.addf %135, %157 : vector<4x128xf32>
    %159 = vector.broadcast %149 : vector<1x128xf32> to vector<4x128xf32>
    %160 = arith.mulf %159, %155 : vector<4x128xf32>
    %161 = arith.subf %158, %160 : vector<4x128xf32>
    %162 = vector.broadcast %145 : vector<1x128xf32> to vector<4x128xf32>
    %163 = arith.mulf %162, %155 : vector<4x128xf32>
    %164 = arith.addf %141, %163 : vector<4x128xf32>
    %165 = vector.broadcast %149 : vector<1x128xf32> to vector<4x128xf32>
    %166 = arith.mulf %165, %152 : vector<4x128xf32>
    %167 = arith.addf %164, %166 : vector<4x128xf32>
    %c2_i32_46 = arith.constant 2 : i32
    %168 = arith.index_cast %c1_i32_29 : i32 to index
    %169 = arith.index_cast %c2_i32_46 : i32 to index
    %c0_47 = arith.constant 0 : index
    %170 = vector.load %arg2[%168, %169, %c0_47] : memref<2x4x128xf32, #tpu.memory_space<vmem>>, vector<1x1x128xf32>
    %171 = vector.shape_cast %170 : vector<1x1x128xf32> to vector<1x128xf32>
    %172 = arith.index_cast %c1_i32_29 : i32 to index
    %173 = arith.index_cast %c2_i32_46 : i32 to index
    %c0_48 = arith.constant 0 : index
    %174 = vector.load %arg3[%172, %173, %c0_48] : memref<2x4x128xf32, #tpu.memory_space<vmem>>, vector<1x1x128xf32>
    %175 = vector.shape_cast %174 : vector<1x1x128xf32> to vector<1x128xf32>
    %176 = arith.index_cast %c2_i32_46 : i32 to index
    %c0_49 = arith.constant 0 : index
    %c0_50 = arith.constant 0 : index
    %177 = vector.load %arg4[%176, %c0_49, %c0_50] : memref<4x4x128xf32, #tpu.memory_space<vmem>>, vector<1x4x128xf32>
    %178 = vector.shape_cast %177 : vector<1x4x128xf32> to vector<4x128xf32>
    %179 = arith.index_cast %c2_i32_46 : i32 to index
    %c0_51 = arith.constant 0 : index
    %c0_52 = arith.constant 0 : index
    %180 = vector.load %arg5[%179, %c0_51, %c0_52] : memref<4x4x128xf32, #tpu.memory_space<vmem>>, vector<1x4x128xf32>
    %181 = vector.shape_cast %180 : vector<1x4x128xf32> to vector<4x128xf32>
    %182 = vector.broadcast %171 : vector<1x128xf32> to vector<4x128xf32>
    %183 = arith.mulf %182, %178 : vector<4x128xf32>
    %184 = arith.addf %161, %183 : vector<4x128xf32>
    %185 = vector.broadcast %175 : vector<1x128xf32> to vector<4x128xf32>
    %186 = arith.mulf %185, %181 : vector<4x128xf32>
    %187 = arith.subf %184, %186 : vector<4x128xf32>
    %188 = vector.broadcast %171 : vector<1x128xf32> to vector<4x128xf32>
    %189 = arith.mulf %188, %181 : vector<4x128xf32>
    %190 = arith.addf %167, %189 : vector<4x128xf32>
    %191 = vector.broadcast %175 : vector<1x128xf32> to vector<4x128xf32>
    %192 = arith.mulf %191, %178 : vector<4x128xf32>
    %193 = arith.addf %190, %192 : vector<4x128xf32>
    %c3_i32_53 = arith.constant 3 : i32
    %194 = arith.index_cast %c1_i32_29 : i32 to index
    %195 = arith.index_cast %c3_i32_53 : i32 to index
    %c0_54 = arith.constant 0 : index
    %196 = vector.load %arg2[%194, %195, %c0_54] : memref<2x4x128xf32, #tpu.memory_space<vmem>>, vector<1x1x128xf32>
    %197 = vector.shape_cast %196 : vector<1x1x128xf32> to vector<1x128xf32>
    %198 = arith.index_cast %c1_i32_29 : i32 to index
    %199 = arith.index_cast %c3_i32_53 : i32 to index
    %c0_55 = arith.constant 0 : index
    %200 = vector.load %arg3[%198, %199, %c0_55] : memref<2x4x128xf32, #tpu.memory_space<vmem>>, vector<1x1x128xf32>
    %201 = vector.shape_cast %200 : vector<1x1x128xf32> to vector<1x128xf32>
    %202 = arith.index_cast %c3_i32_53 : i32 to index
    %c0_56 = arith.constant 0 : index
    %c0_57 = arith.constant 0 : index
    %203 = vector.load %arg4[%202, %c0_56, %c0_57] : memref<4x4x128xf32, #tpu.memory_space<vmem>>, vector<1x4x128xf32>
    %204 = vector.shape_cast %203 : vector<1x4x128xf32> to vector<4x128xf32>
    %205 = arith.index_cast %c3_i32_53 : i32 to index
    %c0_58 = arith.constant 0 : index
    %c0_59 = arith.constant 0 : index
    %206 = vector.load %arg5[%205, %c0_58, %c0_59] : memref<4x4x128xf32, #tpu.memory_space<vmem>>, vector<1x4x128xf32>
    %207 = vector.shape_cast %206 : vector<1x4x128xf32> to vector<4x128xf32>
    %208 = vector.broadcast %197 : vector<1x128xf32> to vector<4x128xf32>
    %209 = arith.mulf %208, %204 : vector<4x128xf32>
    %210 = arith.addf %187, %209 : vector<4x128xf32>
    %211 = vector.broadcast %201 : vector<1x128xf32> to vector<4x128xf32>
    %212 = arith.mulf %211, %207 : vector<4x128xf32>
    %213 = arith.subf %210, %212 : vector<4x128xf32>
    %214 = vector.broadcast %197 : vector<1x128xf32> to vector<4x128xf32>
    %215 = arith.mulf %214, %207 : vector<4x128xf32>
    %216 = arith.addf %193, %215 : vector<4x128xf32>
    %217 = vector.broadcast %201 : vector<1x128xf32> to vector<4x128xf32>
    %218 = arith.mulf %217, %204 : vector<4x128xf32>
    %219 = arith.addf %216, %218 : vector<4x128xf32>
    %c4_i32_60 = arith.constant 4 : i32
    %220 = arith.index_cast %c1_i32_29 : i32 to index
    %c0_61 = arith.constant 0 : index
    %c0_62 = arith.constant 0 : index
    %221 = vector.load %arg6[%220, %c0_61, %c0_62] : memref<2x4x128xf32, #tpu.memory_space<vmem>>, vector<1x4x128xf32>
    %222 = vector.shape_cast %221 : vector<1x4x128xf32> to vector<4x128xf32>
    %223 = vector.shape_cast %213 : vector<4x128xf32> to vector<1x4x128xf32>
    tpu.vector_store %arg6[%220, %c0_61, %c0_62], %223 {strides = array<i32>} : memref<2x4x128xf32, #tpu.memory_space<vmem>>, vector<1x4x128xf32>,
    %224 = arith.index_cast %c1_i32_29 : i32 to index
    %c0_63 = arith.constant 0 : index
    %c0_64 = arith.constant 0 : index
    %225 = vector.load %arg7[%224, %c0_63, %c0_64] : memref<2x4x128xf32, #tpu.memory_space<vmem>>, vector<1x4x128xf32>
    %226 = vector.shape_cast %225 : vector<1x4x128xf32> to vector<4x128xf32>
    %227 = vector.shape_cast %219 : vector<4x128xf32> to vector<1x4x128xf32>
    tpu.vector_store %arg7[%224, %c0_63, %c0_64], %227 {strides = array<i32>} : memref<2x4x128xf32, #tpu.memory_space<vmem>>, vector<1x4x128xf32>,
    %c2_i32_65 = arith.constant 2 : i32
    return
  }
  func.func @transform_0(%arg0: i32, %arg1: i32) -> (i32, i32, i32) {
    %c0_i32 = arith.constant 0 : i32
    %c0_i32_0 = arith.constant 0 : i32
    %c0_i32_1 = arith.constant 0 : i32
    return %c0_i32, %c0_i32_0, %arg0 : i32, i32, i32
  }
  func.func @transform_1(%arg0: i32, %arg1: i32) -> (i32, i32, i32) {
    %c0_i32 = arith.constant 0 : i32
    %c0_i32_0 = arith.constant 0 : i32
    %c0_i32_1 = arith.constant 0 : i32
    return %c0_i32, %c0_i32_0, %arg0 : i32, i32, i32
  }
  func.func @transform_2(%arg0: i32, %arg1: i32) -> (i32, i32, i32) {
    %c0_i32 = arith.constant 0 : i32
    %c0_i32_0 = arith.constant 0 : i32
    return %c0_i32, %arg1, %arg0 : i32, i32, i32
  }
  func.func @transform_3(%arg0: i32, %arg1: i32) -> (i32, i32, i32) {
    %c0_i32 = arith.constant 0 : i32
    %c0_i32_0 = arith.constant 0 : i32
    return %c0_i32, %arg1, %arg0 : i32, i32, i32
  }
  func.func @transform_4(%arg0: i32, %arg1: i32) -> (i32, i32, i32) {
    %c0_i32 = arith.constant 0 : i32
    %c0_i32_0 = arith.constant 0 : i32
    return %c0_i32, %arg1, %arg0 : i32, i32, i32
  }
  func.func @transform_5(%arg0: i32, %arg1: i32) -> (i32, i32, i32) {
    %c0_i32 = arith.constant 0 : i32
    %c0_i32_0 = arith.constant 0 : i32
    return %c0_i32, %arg1, %arg0 : i32, i32, i32
  }
}

module attributes {stable_mosaic.version = 11 : i64} {
  func.func @pointwise_kernel(%arg0: i32, %arg1: i32, %arg2: memref<1x4x256xf32, #tpu.memory_space<vmem>>, %arg3: memref<1x4x256xf32, #tpu.memory_space<vmem>>, %arg4: memref<4x4xf32, #tpu.memory_space<vmem>>, %arg5: memref<4x1xf32, #tpu.memory_space<vmem>>, %arg6: memref<1x4x256xf32, #tpu.memory_space<vmem>>) attributes {dimension_semantics = [#tpu.dimension_semantics<parallel>, #tpu.dimension_semantics<parallel>], iteration_bounds = array<i64: 2, 1>, scalar_prefetch = 0 : i64, scratch_operands = 0 : i64, tpu.core_type = #tpu.core_type<tc>, window_params = [{transform_indices = @transform_0, window_bounds = array<i64: 1, 4, 256>}, {transform_indices = @transform_1, window_bounds = array<i64: 1, 4, 256>}, {pipeline_mode = #tpu.pipeline_mode<synchronous>, transform_indices = @transform_2, window_bounds = array<i64: 4, 4>}, {pipeline_mode = #tpu.pipeline_mode<synchronous>, transform_indices = @transform_3, window_bounds = array<i64: 4, 1>}, {transform_indices = @transform_4, window_bounds = array<i64: 1, 4, 256>}]} {
    %c0 = arith.constant 0 : index
    %c0_0 = arith.constant 0 : index
    %c0_1 = arith.constant 0 : index
    %0 = vector.load %arg2[%c0, %c0_0, %c0_1] : memref<1x4x256xf32, #tpu.memory_space<vmem>>, vector<1x4x256xf32>
    %1 = vector.shape_cast %0 : vector<1x4x256xf32> to vector<4x256xf32>
    %c0_2 = arith.constant 0 : index
    %c0_3 = arith.constant 0 : index
    %2 = vector.load %arg4[%c0_2, %c0_3] : memref<4x4xf32, #tpu.memory_space<vmem>>, vector<4x4xf32>
    %cst = arith.constant 0.000000e+00 : f32
    %3 = vector.broadcast %cst : f32 to vector<4x256xf32>
    %4 = vector.extract_strided_slice %2 {offsets = [0, 0], sizes = [4, 1], strides = [1, 1]} : vector<4x4xf32> to vector<4x1xf32>
    %5 = vector.extract_strided_slice %1 {offsets = [0, 0], sizes = [1, 256], strides = [1, 1]} : vector<4x256xf32> to vector<1x256xf32>
    %6 = vector.broadcast %4 : vector<4x1xf32> to vector<4x256xf32>
    %7 = vector.broadcast %5 : vector<1x256xf32> to vector<4x256xf32>
    %8 = arith.mulf %6, %7 : vector<4x256xf32>
    %9 = arith.addf %3, %8 : vector<4x256xf32>
    %10 = vector.extract_strided_slice %2 {offsets = [0, 1], sizes = [4, 1], strides = [1, 1]} : vector<4x4xf32> to vector<4x1xf32>
    %11 = vector.extract_strided_slice %1 {offsets = [1, 0], sizes = [1, 256], strides = [1, 1]} : vector<4x256xf32> to vector<1x256xf32>
    %12 = vector.broadcast %10 : vector<4x1xf32> to vector<4x256xf32>
    %13 = vector.broadcast %11 : vector<1x256xf32> to vector<4x256xf32>
    %14 = arith.mulf %12, %13 : vector<4x256xf32>
    %15 = arith.addf %9, %14 : vector<4x256xf32>
    %16 = vector.extract_strided_slice %2 {offsets = [0, 2], sizes = [4, 1], strides = [1, 1]} : vector<4x4xf32> to vector<4x1xf32>
    %17 = vector.extract_strided_slice %1 {offsets = [2, 0], sizes = [1, 256], strides = [1, 1]} : vector<4x256xf32> to vector<1x256xf32>
    %18 = vector.broadcast %16 : vector<4x1xf32> to vector<4x256xf32>
    %19 = vector.broadcast %17 : vector<1x256xf32> to vector<4x256xf32>
    %20 = arith.mulf %18, %19 : vector<4x256xf32>
    %21 = arith.addf %15, %20 : vector<4x256xf32>
    %22 = vector.extract_strided_slice %2 {offsets = [0, 3], sizes = [4, 1], strides = [1, 1]} : vector<4x4xf32> to vector<4x1xf32>
    %23 = vector.extract_strided_slice %1 {offsets = [3, 0], sizes = [1, 256], strides = [1, 1]} : vector<4x256xf32> to vector<1x256xf32>
    %24 = vector.broadcast %22 : vector<4x1xf32> to vector<4x256xf32>
    %25 = vector.broadcast %23 : vector<1x256xf32> to vector<4x256xf32>
    %26 = arith.mulf %24, %25 : vector<4x256xf32>
    %27 = arith.addf %21, %26 : vector<4x256xf32>
    %c0_4 = arith.constant 0 : index
    %c0_5 = arith.constant 0 : index
    %28 = vector.load %arg5[%c0_4, %c0_5] : memref<4x1xf32, #tpu.memory_space<vmem>>, vector<4x1xf32>
    %29 = vector.broadcast %28 : vector<4x1xf32> to vector<4x256xf32>
    %30 = arith.addf %27, %29 : vector<4x256xf32>
    %c0_6 = arith.constant 0 : index
    %c0_7 = arith.constant 0 : index
    %c0_8 = arith.constant 0 : index
    %31 = vector.load %arg3[%c0_6, %c0_7, %c0_8] : memref<1x4x256xf32, #tpu.memory_space<vmem>>, vector<1x4x256xf32>
    %32 = vector.shape_cast %31 : vector<1x4x256xf32> to vector<4x256xf32>
    %33 = arith.addf %30, %32 : vector<4x256xf32>
    %cst_9 = arith.constant 0.000000e+00 : f32
    %34 = vector.broadcast %cst_9 : f32 to vector<4x256xf32>
    %35 = arith.maximumf %33, %34 : vector<4x256xf32>
    %c0_10 = arith.constant 0 : index
    %c0_11 = arith.constant 0 : index
    %c0_12 = arith.constant 0 : index
    %36 = vector.load %arg6[%c0_10, %c0_11, %c0_12] : memref<1x4x256xf32, #tpu.memory_space<vmem>>, vector<1x4x256xf32>
    %37 = vector.shape_cast %36 : vector<1x4x256xf32> to vector<4x256xf32>
    %38 = vector.shape_cast %35 : vector<4x256xf32> to vector<1x4x256xf32>
    tpu.vector_store %arg6[%c0_10, %c0_11, %c0_12], %38 {strides = array<i32>} : memref<1x4x256xf32, #tpu.memory_space<vmem>>, vector<1x4x256xf32>,
    return
  }
  func.func @transform_0(%arg0: i32, %arg1: i32) -> (i32, i32, i32) {
    %c0_i32 = arith.constant 0 : i32
    %c0_i32_0 = arith.constant 0 : i32
    return %arg0, %c0_i32, %arg1 : i32, i32, i32
  }
  func.func @transform_1(%arg0: i32, %arg1: i32) -> (i32, i32, i32) {
    %c0_i32 = arith.constant 0 : i32
    %c0_i32_0 = arith.constant 0 : i32
    return %arg0, %c0_i32, %arg1 : i32, i32, i32
  }
  func.func @transform_2(%arg0: i32, %arg1: i32) -> (i32, i32) {
    %c0_i32 = arith.constant 0 : i32
    %c0_i32_0 = arith.constant 0 : i32
    %c0_i32_1 = arith.constant 0 : i32
    return %c0_i32, %c0_i32_0 : i32, i32
  }
  func.func @transform_3(%arg0: i32, %arg1: i32) -> (i32, i32) {
    %c0_i32 = arith.constant 0 : i32
    %c0_i32_0 = arith.constant 0 : i32
    %c0_i32_1 = arith.constant 0 : i32
    return %c0_i32, %c0_i32_0 : i32, i32
  }
  func.func @transform_4(%arg0: i32, %arg1: i32) -> (i32, i32, i32) {
    %c0_i32 = arith.constant 0 : i32
    %c0_i32_0 = arith.constant 0 : i32
    return %arg0, %c0_i32, %arg1 : i32, i32, i32
  }
}

</mosaic_0001>

<bundles_post_ra>
// kernel: fno_block_forward.2
= control target key start
LH: loop header
LB: loop body
LE: loop exit
PB: predicated region body
PF: predicated region fallthrough
CT: control target
= control target key end

     0   :  { %s377_s0 = inlined_call_operand.vmem [shape: f32[2,4,128], index: 0, kind: input, shape index: {}]   ;;  %s378_s1 = inlined_call_operand.vmem [shape: f32[2,4,128], index: 1, kind: input, shape index: {}]   ;;  %s379_s2 = inlined_call_operand.vmem [shape: f32[4,4,128], index: 2, kind: input, shape index: {}]   ;;  %s380_s3 = inlined_call_operand.vmem [shape: f32[4,4,128], index: 3, kind: input, shape index: {}]   ;;  %s381_s4 = inlined_call_operand.vmem [shape: f32[2,4,128], index: 4, kind: output, shape index: {0}]   ;;  %s382_s5 = inlined_call_operand.vmem [shape: f32[2,4,128], index: 5, kind: output, shape index: {1}]  }
   0x1   :  { %v201_v0 = vld [vmem:[%s377_s0] ss:$0 sm:$0xff]  ;;  %v205_v5 = vld [vmem:[%s377_s0 + $0x1] ss:$0 sm:$0xff]  ;;  %v203_v9 = vld [vmem:[%s379_s2 + $0x4] sm:$0xf] }
   0x2   :  { %v202_v1 = vld [vmem:[%s378_s1] ss:$0 sm:$0xff]  ;;  %v206_v6 = vld [vmem:[%s378_s1 + $0x1] ss:$0 sm:$0xff]  ;;  %v204_v10 = vld [vmem:[%s380_s3 + $0x4] sm:$0xf]  ;;  %v49_v13 = vmul.f32 %v205_v5, %v203_v9 }
   0x3   :  { %v21_v2 = vld [vmem:[%s379_s2] sm:$0xf]  ;;  %v207_v15 = vld [vmem:[%s379_s2 + $0x8] sm:$0xf]  ;;  %v57_v17 = vmul.f32 %v205_v5, %v204_v10  ;;  %v55_v19 = vmul.f32 %v206_v6, %v204_v10  ;;  %v211_v21 = vld [vmem:[%s379_s2 + $0xc] sm:$0xf]  ;;  %v59_v23 = vmul.f32 %v206_v6, %v203_v9 }
   0x4   :  { %v22_v3 = vld [vmem:[%s380_s3] sm:$0xf]  ;;  %v27_v4 = vmul.f32 %v201_v0, %v21_v2  ;;  %v37_v7 = vmul.f32 %v202_v1, %v21_v2  ;;  %v208_v16 = vld [vmem:[%s380_s3 + $0x8] sm:$0xf]  ;;  %v212_v26 = vld [vmem:[%s380_s3 + $0xc] sm:$0xf] }
   0x5   :  { %v33_v8 = vmul.f32 %v202_v1, %v22_v3  ;;  %v209_v11 = vld [vmem:[%s377_s0 + $0x2] ss:$0 sm:$0xff]  ;;  %v35_v12 = vmul.f32 %v201_v0, %v22_v3  ;;  %v213_v20 = vld [vmem:[%s377_s0 + $0x3] ss:$0 sm:$0xff]  ;;  %v217_v27 = vld [vmem:[%s377_s0 + $0x4] ss:$0 sm:$0xff] }
   0x6   :  { %v210_v14 = vld [vmem:[%s378_s1 + $0x2] ss:$0 sm:$0xff]  ;;  %v71_v24 = vmul.f32 %v209_v11, %v207_v15  ;;  %v218_v28 = vld [vmem:[%s378_s1 + $0x4] ss:$0 sm:$0xff]  ;;  %v93_v30 = vmul.f32 %v213_v20, %v211_v21  ;;  %v79_v32 = vmul.f32 %v209_v11, %v208_v16  ;;  %v223_v35 = vld [vmem:[%s377_s0 + $0x5] ss:$0 sm:$0xff]  ;;  %v101_v57 = vmul.f32 %v213_v20, %v212_v26 }
   0x7   :  { %v34_v18 = vsub.f32 %v27_v4, %v33_v8  ;;  %v38_v22 = vadd.f32 %v37_v7, %v35_v12  ;;  %v77_v25 = vmul.f32 %v210_v14, %v208_v16  ;;  %v111_v33 = vld [vmem:[%s379_s2] sm:$0xf]  ;;  %v224_v38 = vld [vmem:[%s378_s1 + $0x5] ss:$0 sm:$0xff]  ;;  %v81_v46 = vmul.f32 %v210_v14, %v207_v15  ;;  %v229_v48 = vld [vmem:[%s377_s0 + $0x6] ss:$0 sm:$0xff] }
   0x8   :  { %v112_v34 = vld [vmem:[%s380_s3] sm:$0xf]  ;;  %v117_v36 = vmul.f32 %v217_v27, %v111_v33  ;;  %v221_v39 = vld [vmem:[%s379_s2 + $0x4] sm:$0xf]  ;;  %v127_v42 = vmul.f32 %v218_v28, %v111_v33  ;;  %v227_v49 = vld [vmem:[%s379_s2 + $0x8] sm:$0xf] }
   0x9   :  { %v50_v29 = vadd.f32 %v49_v13, %v34_v18  ;;  %v58_v31 = vadd.f32 %v57_v17, %v38_v22  ;;  %v123_v37 = vmul.f32 %v218_v28, %v112_v34  ;;  %v222_v40 = vld [vmem:[%s380_s3 + $0x4] sm:$0xf]  ;;  %v125_v41 = vmul.f32 %v217_v27, %v112_v34  ;;  %v214_v44 = vld [vmem:[%s378_s1 + $0x3] ss:$0 sm:$0xff]  ;;  %v228_v52 = vld [vmem:[%s380_s3 + $0x8] sm:$0xf] }
   0xa   :  { %v137_v47 = vmul.f32 %v223_v35, %v221_v39  ;;  %v143_v51 = vmul.f32 %v224_v38, %v222_v40  ;;  %v145_v54 = vmul.f32 %v223_v35, %v222_v40  ;;  %v230_v58 = vld [vmem:[%s378_s1 + $0x6] ss:$0 sm:$0xff]  ;;  %v147_v59 = vmul.f32 %v224_v38, %v221_v39  ;;  %v235_v3 = vld [vmem:[%s377_s0 + $0x7] ss:$0 sm:$0xff]  ;;  %v233_v4 = vld [vmem:[%s379_s2 + $0xc] sm:$0xf] }
   0xb   :  { %v56_v43 = vsub.f32 %v50_v29, %v55_v19  ;;  %v60_v45 = vadd.f32 %v59_v23, %v58_v31  ;;  %v124_v50 = vsub.f32 %v117_v36, %v123_v37  ;;  %v128_v53 = vadd.f32 %v127_v42, %v125_v41  ;;  %v234_v5 = vld [vmem:[%s380_s3 + $0xc] sm:$0xf]  ;;  %v236_v13 = vld [vmem:[%s378_s1 + $0x7] ss:$0 sm:$0xff] }
   0xc   :  { %v103_v60 = vmul.f32 %v214_v44, %v211_v21  ;;  %v157_v62 = vmul.f32 %v229_v48, %v227_v49  ;;  %v99_v1 = vmul.f32 %v214_v44, %v212_v26  ;;  %v165_v6 = vmul.f32 %v229_v48, %v228_v52 }
   0xd   :  { %v72_v55 = vadd.f32 %v71_v24, %v56_v43  ;;  %v80_v56 = vadd.f32 %v79_v32, %v60_v45  ;;  %v138_v61 = vadd.f32 %v137_v47, %v124_v50  ;;  %v146_v63 = vadd.f32 %v145_v54, %v128_v53 }
   0xe   :  { %v163_v8 = vmul.f32 %v230_v58, %v228_v52  ;;  %v167_v10 = vmul.f32 %v230_v58, %v227_v49  ;;  %v177_v15 = vmul.f32 %v235_v3, %v233_v4  ;;  %v185_v17 = vmul.f32 %v235_v3, %v234_v5 }
   0xf   :  { %v78_v0 = vsub.f32 %v72_v55, %v77_v25  ;;  %v82_v2 = vadd.f32 %v81_v46, %v80_v56  ;;  %v144_v7 = vsub.f32 %v138_v61, %v143_v51  ;;  %v148_v9 = vadd.f32 %v147_v59, %v146_v63 }
  0x10   :  { %v183_v21 = vmul.f32 %v236_v13, %v234_v5  ;;  %v187_v23 = vmul.f32 %v236_v13, %v233_v4 }
  0x11   :  { %v94_v11 = vadd.f32 %v93_v30, %v78_v0  ;;  %v102_v12 = vadd.f32 %v101_v57, %v82_v2  ;;  %v158_v14 = vadd.f32 %v157_v62, %v144_v7  ;;  %v166_v16 = vadd.f32 %v165_v6, %v148_v9 }
  0x13   :  { %v100_v18 = vsub.f32 %v94_v11, %v99_v1  ;;  %v104_v19 = vadd.f32 %v103_v60, %v102_v12  ;;  %v164_v20 = vsub.f32 %v158_v14, %v163_v8  ;;  %v168_v22 = vadd.f32 %v167_v10, %v166_v16 }
  0x15   :  { %105 = vst [vmem:[%s381_s4] sm:$0xf] %v100_v18  ;;  %106 = vst [vmem:[%s382_s5] sm:$0xf] %v104_v19  ;;  %v178_v24 = vadd.f32 %v177_v15, %v164_v20  ;;  %v186_v25 = vadd.f32 %v185_v17, %v168_v22 }
  0x17   :  { %v184_v26 = vsub.f32 %v178_v24, %v183_v21  ;;  %v188_v27 = vadd.f32 %v187_v23, %v186_v25 }
  0x19   :  { %237 = vst [vmem:[%s381_s4 + $0x4] sm:$0xf] %v184_v26  ;;  %238 = vst [vmem:[%s382_s5 + $0x4] sm:$0xf] %v188_v27 }

// kernel: reverse.0
= control target key start
LH: loop header
LB: loop body
LE: loop exit
PB: predicated region body
PF: predicated region fallthrough
CT: control target
= control target key end

     0   :  { %v72_v3 = vlaneseq  ;;  %v65_v9 = vld [vmem:[#allocation0 + $0x7] ss:$-1 sm:$0xff]  ;;  %v79_v12 = vld [vmem:[#allocation0 + $0x17] ss:$-1 sm:$0xff]  ;;  %s331_s0 = inlined_call_operand.vmem [shape: f32[2,4,16,7], index: 0, kind: input, shape index: {}]   ;;  %s332_s1 = inlined_call_operand.vmem [shape: f32[2,4,16,7], index: 1, kind: output, shape index: {}]  }
   0x1   :  { %v45_v0 = vld [vmem:[%s331_s0] sm:$0xff]  ;;  %v47_v1 = vld [vmem:[%s331_s0 + $0x8] sm:$0xff]  ;;  %v49_v2 = vld [vmem:[%s331_s0 + $0x10] sm:$0xff]  ;;  %v66_v10 = vrot.slane %v65_v9, 1  ;;  %v80_v14 = vrot.slane %v79_v12, 1 }
   0x2   :  { %46 = vst [vmem:[#allocation0 + $0x8] sm:$0xff] %v45_v0  ;;  %48 = vst [vmem:[#allocation0 + $0x18] sm:$0xff] %v47_v1  ;;  %v51_v4 = vld [vmem:[%s331_s0 + $0x18] sm:$0xff]  ;;  %v53_v5 = vld [vmem:[%s331_s0 + $0x20] sm:$0xff]  ;;  %v73_v11 = vshrl.u32 %v72_v3, 7 }
   0x3   :  { %50 = vst [vmem:[#allocation0 + $0x28] sm:$0xff] %v49_v2  ;;  %v55_v6 = vld [vmem:[%s331_s0 + $0x28] sm:$0xff]  ;;  %52 = vst [vmem:[#allocation0 + $0x38] sm:$0xff] %v51_v4  ;;  %v57_v7 = vld [vmem:[%s331_s0 + $0x30] sm:$0xff] }
   0x4   :  { %54 = vst [vmem:[#allocation0 + $0x48] sm:$0xff] %v53_v5  ;;  %56 = vst [vmem:[#allocation0 + $0x58] sm:$0xff] %v55_v6  ;;  %v59_v8 = vld [vmem:[%s331_s0 + $0x38] sm:$0xff]  ;;  %v93_v13 = vld [vmem:[#allocation0 + $0x27] ss:$-1 sm:$0xff]  ;;  %vm74_vm0 = vcmp.lt.s32.totalorder %v73_v11, 7 }
   0x5   :  { %58 = vst [vmem:[#allocation0 + $0x68] sm:$0xff] %v57_v7  ;;  %60 = vst [vmem:[#allocation0 + $0x78] sm:$0xff] %v59_v8  ;;  %v94_v15 = vrot.slane %v93_v13, 1  ;;  %v107_v16 = vld [vmem:[#allocation0 + $0x37] ss:$-1 sm:$0xff] }
   0x6   :  { %67 = vst [vmem:[#allocation1] sm:$0xff] %v66_v10  ;;  %v108_v17 = vrot.slane %v107_v16, 1  ;;  %v121_v18 = vld [vmem:[#allocation0 + $0x47] ss:$-1 sm:$0xff]  ;;  %v135_v19 = vld [vmem:[#allocation0 + $0x57] ss:$-1 sm:$0xff] }
   0x7   :  { %81 = vst [vmem:[#allocation1 + $0x8] sm:$0xff] %v80_v14  ;;  %95 = vst [vmem:[#allocation1 + $0x10] sm:$0xff] %v94_v15  ;;  %v122_v20 = vrot.slane %v121_v18, 1  ;;  %v136_v21 = vrot.slane %v135_v19, 1  ;;  %v149_v22 = vld [vmem:[#allocation0 + $0x67] ss:$-1 sm:$0xff] }
   0x8   :  { %v163_v23 = vld [vmem:[#allocation0 + $0x77] ss:$-1 sm:$0xff]  ;;  %109 = vst [vmem:[#allocation1 + $0x18] sm:$0xff] %v108_v17  ;;  %v150_v24 = vrot.slane %v149_v22, 1 }
   0x9   :  { %v164_v25 = vrot.slane %v163_v23, 1  ;;  %v70_v26 = vld [vmem:[#allocation0 + $0xf] ss:$-1 sm:$0xff]  ;;  %v84_v27 = vld [vmem:[#allocation0 + $0x1f] ss:$-1 sm:$0xff]  ;;  %123 = vst [vmem:[#allocation1 + $0x20] sm:$0xff] %v122_v20 }
   0xa   :  { %v98_v28 = vld [vmem:[#allocation0 + $0x2f] ss:$-1 sm:$0xff]  ;;  %137 = vst [vmem:[#allocation1 + $0x28] sm:$0xff] %v136_v21  ;;  %v71_v29 = vrot.slane %v70_v26, 1  ;;  %v85_v30 = vrot.slane %v84_v27, 1  ;;  %151 = vst [vmem:[#allocation1 + $0x30] sm:$0xff] %v150_v24 }
   0xb   :  { %v99_v31 = vrot.slane %v98_v28, 1  ;;  %v112_v32 = vld [vmem:[#allocation0 + $0x3f] ss:$-1 sm:$0xff]  ;;  %165 = vst [vmem:[#allocation1 + $0x38] sm:$0xff] %v164_v25  ;;  %v126_v34 = vld [vmem:[#allocation0 + $0x4f] ss:$-1 sm:$0xff] }
   0xc   :  { %v113_v33 = vrot.slane %v112_v32, 1  ;;  %v140_v35 = vld [vmem:[#allocation0 + $0x5f] ss:$-1 sm:$0xff]  ;;  %75 = vst.msk [vmem:[#allocation1] sm:$0xff] %vm74_vm0, %v71_v29  ;;  %89 = vst.msk [vmem:[#allocation1 + $0x8] sm:$0xff] %vm74_vm0, %v85_v30  ;;  %v127_v36 = vrot.slane %v126_v34, 1 }
   0xd   :  { %103 = vst.msk [vmem:[#allocation1 + $0x10] sm:$0xff] %vm74_vm0, %v99_v31  ;;  %v141_v37 = vrot.slane %v140_v35, 1  ;;  %v154_v38 = vld [vmem:[#allocation0 + $0x6f] ss:$-1 sm:$0xff]  ;;  %v168_v39 = vld [vmem:[#allocation0 + $0x7f] ss:$-1 sm:$0xff] }
   0xe   :  { %117 = vst.msk [vmem:[#allocation1 + $0x18] sm:$0xff] %vm74_vm0, %v113_v33  ;;  %v155_v40 = vrot.slane %v154_v38, 1  ;;  %v169_v41 = vrot.slane %v168_v39, 1  ;;  %131 = vst.msk [vmem:[#allocation1 + $0x20] sm:$0xff] %vm74_vm0, %v127_v36 }
   0xf   :  { %145 = vst.msk [vmem:[#allocation1 + $0x28] sm:$0xff] %vm74_vm0, %v141_v37 }
  0x10   :  { %159 = vst.msk [vmem:[#allocation1 + $0x30] sm:$0xff] %vm74_vm0, %v155_v40  ;;  %173 = vst.msk [vmem:[#allocation1 + $0x38] sm:$0xff] %vm74_vm0, %v169_v41 }
  0x13   :  { %v216_v42 = vld [vmem:[#allocation1] sm:$0xff]  ;;  %v218_v43 = vld [vmem:[#allocation1 + $0x8] sm:$0xff] }
  0x14   :  { %v220_v44 = vld [vmem:[#allocation1 + $0x10] sm:$0xff]  ;;  %217 = vst [vmem:[%s332_s1] sm:$0xff] %v216_v42  ;;  %219 = vst [vmem:[%s332_s1 + $0x8] sm:$0xff] %v218_v43 }
  0x15   :  { %221 = vst [vmem:[%s332_s1 + $0x10] sm:$0xff] %v220_v44  ;;  %v222_v45 = vld [vmem:[#allocation1 + $0x18] sm:$0xff]  ;;  %v224_v46 = vld [vmem:[#allocation1 + $0x20] sm:$0xff] }
  0x16   :  { %223 = vst [vmem:[%s332_s1 + $0x18] sm:$0xff] %v222_v45  ;;  %v226_v47 = vld [vmem:[#allocation1 + $0x28] sm:$0xff]  ;;  %225 = vst [vmem:[%s332_s1 + $0x20] sm:$0xff] %v224_v46 }
  0x17   :  { %227 = vst [vmem:[%s332_s1 + $0x28] sm:$0xff] %v226_v47  ;;  %v228_v48 = vld [vmem:[#allocation1 + $0x30] sm:$0xff]  ;;  %v230_v49 = vld [vmem:[#allocation1 + $0x38] sm:$0xff] }
  0x18   :  { %229 = vst [vmem:[%s332_s1 + $0x30] sm:$0xff] %v228_v48  ;;  %231 = vst [vmem:[%s332_s1 + $0x38] sm:$0xff] %v230_v49 }

// kernel: fno_block_forward.3
= control target key start
LH: loop header
LB: loop body
LE: loop exit
PB: predicated region body
PF: predicated region fallthrough
CT: control target
= control target key end

     0   :  { %s611_s15 = smov 0   ;;  %s613_s16 = smov 0   ;;  %s658_s0 = inlined_call_operand.vmem [shape: f32[2,4,256], index: 0, kind: input, shape index: {}]   ;;  %s659_s1 = inlined_call_operand.vmem [shape: f32[2,4,256], index: 1, kind: input, shape index: {}, may-alias: {1,4}]   ;;  %s660_s2 = inlined_call_operand.vmem [shape: f32[4,4], index: 2, kind: input, shape index: {}]   ;;  %s661_s3 = inlined_call_operand.vmem [shape: f32[4,1], index: 3, kind: input, shape index: {}]   ;;  %s662_s4 = inlined_call_operand.vmem [shape: f32[2,4,256], index: 4, kind: output, shape index: {}, may-alias: {1,4}]  }
   0x1   :  { %s615_s17 = smov 0  }
   0x2 LB: > { %s26_s18 = sadd.s32 1, %s576_s16  ;;  %p511_p0 = scmp.ge.s32.totalorder %s580_s17, 1  ;;  %s580_s17 = sphi %s615_s17, %s14_s17   ;;  %s576_s16 = sphi %s613_s16, %s664_s16   ;;  %s572_s15 = sphi %s611_s15, %s663_s15  }
   0x3   : > { %p28_p1 = scmp.ge.s32.totalorder %s26_s18, 2  ;;  %p200_p2 = scmp.lt.s32.totalorder %s580_s17, 3 }
   0x5   : > { %s666_s18 = smov (%p28_p1, %s26_s18), 0  ;;  %p201_p3 = pnand %p511_p0, %p200_p2 }
   0x6   : > { %p244_p4 = scmp.lt.s32.totalorder (!%p201_p3), %s572_s15, 1 }
   0x7   : > { %204 = sbr.rel (%p201_p3) target bundleno = 160 (0xa0), region = 36 }
   0xc   : > { %v274_v0 = vld [vmem:[%s660_s2] sm:$0xf]  ;;  %v582_v1 = vmov 0   ;;  %v583_v2 = vmov 2   ;;  %v584_v3 = vmov 1   ;;  %v585_v4 = vmov 3  }
   0xd   : > { %551 = vset.pattern.permute.xlu0 %v582_v1  ;;  %553 = vset.pattern.permute.xlu1 %v583_v2  ;;  %v381_v5 = vld [vmem:[%s661_s3] sm:$0xf]  ;;  %s668_s15 = smov (!%p244_p4, %s572_s15), 1  ;;  %v281_v6 = vlaneseq }
   0xe   : > { %277 = vperm.xlu0 %551, %v274_v0   ;;  %330 = vperm.xlu1 %553, %v274_v0   ;;  %s635_s23 = sshll.u32 %s668_s15, 3 }
   0xf   : > { %v282_v7 = vshrl.u32 %v281_v6, 7  ;;  %s251_s26 = scalar_lea.vmem %s658_s0, %s635_s23  ;;  %s261_s29 = scalar_lea.vmem %s659_s1, %s635_s23 }
  0x10   : > { %v273_v12 = vld [vmem:[%s251_s26] sm:$0xff]  ;;  %s271_s6 = scalar_lea.vmem %s662_s4, %s635_s23 }
  0x11   : > { %v283_v8 = vsub.s32 0, %v282_v7  ;;  %v287_v9 = vsub.s32 4, %v282_v7  ;;  %v309_v10 = vsub.s32 1, %v282_v7  ;;  %v313_v11 = vsub.s32 5, %v282_v7  ;;  %v389_v47 = vld [vmem:[%s261_s29] sm:$0xff] }
  0x12   : > { %552 = vset.pattern.permute.xlu0 %v584_v3  ;;  %554 = vset.pattern.permute.xlu1 %v585_v4  ;;  %v335_v13 = vsub.s32 2, %v282_v7  ;;  %v339_v14 = vsub.s32 6, %v282_v7  ;;  %v361_v15 = vsub.s32 3, %v282_v7  ;;  %v365_v16 = vsub.s32 7, %v282_v7 }
  0x13   : > { %304 = vperm.xlu0 %552, %v274_v0   ;;  %356 = vperm.xlu1 %554, %v274_v0   ;;  %v284_v17 = vrot.slane %v273_v12, %v283_v8  ;;  %v288_v18 = vrot.slane %v273_v12, %v287_v9  ;;  %v310_v19 = vrot.slane %v273_v12, %v309_v10 }
  0x14   : > { %v314_v20 = vrot.slane %v273_v12, %v313_v11  ;;  %v336_v21 = vrot.slane %v273_v12, %v335_v13  ;;  %v340_v22 = vrot.slane %v273_v12, %v339_v14  ;;  %v362_v25 = vrot.slane %v273_v12, %v361_v15 }
  0x15   : > { %v366_v26 = vrot.slane %v273_v12, %v365_v16  ;;  %v294_v27 = vrot.slane %v284_v17, %v283_v8  ;;  %v298_v28 = vrot.slane %v288_v18, %v283_v8  ;;  %v320_v29 = vrot.slane %v310_v19, %v309_v10 }
  0x16   : > { %v324_v30 = vrot.slane %v314_v20, %v309_v10  ;;  %v346_v31 = vrot.slane %v336_v21, %v335_v13  ;;  %v350_v32 = vrot.slane %v340_v22, %v335_v13  ;;  %v372_v33 = vrot.slane %v362_v25, %v361_v15 }
  0x17   : > { %555 = vset.pattern.permute.xlu1 %v582_v1  ;;  %556 = vset.pattern.permute.xlu0 %v582_v1  ;;  %v376_v34 = vrot.slane %v366_v26, %v361_v15  ;;  %v391_v53 = vcombine.high %v389_v47, %v389_v47 }
  0x18   : > { %384 = vperm.xlu1 %555, %v381_v5  }
  0x89   : > { %v278_v23 = vpop.permute.xlu0 %277  ;;  %v331_v24 = vpop.permute.xlu1 %330 }
  0x8a   : > { %v299_v37 = vmul.f32 %v294_v27, %v278_v23  ;;  %v300_v38 = vmul.f32 %v298_v28, %v278_v23  ;;  %v351_v41 = vmul.f32 %v346_v31, %v331_v24  ;;  %v352_v42 = vmul.f32 %v350_v32, %v331_v24 }
  0x8e   : > { %v305_v35 = vpop.permute.xlu0 %304  ;;  %v357_v36 = vpop.permute.xlu1 %356 }
  0x8f   : > { %v325_v39 = vmul.f32 %v320_v29, %v305_v35  ;;  %v326_v40 = vmul.f32 %v324_v30, %v305_v35  ;;  %v377_v45 = vmul.f32 %v372_v33, %v357_v36  ;;  %v378_v46 = vmul.f32 %v376_v34, %v357_v36 }
  0x91   : > { %v327_v43 = vadd.f32 %v325_v39, %v299_v37  ;;  %v328_v44 = vadd.f32 %v326_v40, %v300_v38 }
  0x93   : > { %v353_v48 = vadd.f32 %v351_v41, %v327_v43  ;;  %v354_v49 = vadd.f32 %v352_v42, %v328_v44  ;;  %v385_v50 = vpop.permute.xlu1 %384 }
  0x95   : > { %v379_v51 = vadd.f32 %v377_v45, %v353_v48  ;;  %v380_v52 = vadd.f32 %v378_v46, %v354_v49 }
  0x97   : > { %v387_v54 = vadd.f32 %v385_v50, %v379_v51  ;;  %v388_v55 = vadd.f32 %v385_v50, %v380_v52 }
  0x99   : > { %v393_v56 = vadd.f32 %v389_v47, %v387_v54  ;;  %v394_v57 = vadd.f32 %v391_v53, %v388_v55 }
  0x9b   : > { %v395_v58 = vmax.f32 %v393_v56, 0.0  ;;  %v396_v59 = vmax.f32 %v394_v57, 0.0 }
  0x9d   : > { %v399_v60 = vcombine.low %v395_v58, %v396_v59 }
  0x9f   : > { %401 = vst [vmem:[%s271_s6] sm:$0xff] %v399_v60 }
  0xa0 PF: > { %s14_s17 = sadd.s32 1, %s580_s17   ;;  %s663_s15 = smov %s576_s16 }
  0xa1   : > { %p11_p5 = scmp.ge.s32.totalorder %s14_s17, 4   ;;  %s664_s16 = smov %s666_s18 }
  0xa3   :  { %13 = sbr.rel (!%p11_p5) target bundleno = 2 (0x2), region = 69 }

</bundles_post_ra>
